<compile_context>
chip_gen: v5e
topology: v5e:2x2
jax: 0.10.0
libtpu: 0.0.40
codegen_flags: <defaults>
</compile_context>

<pallas_src>
import functools
import math

import jax
import jax.numpy as jnp
from jax import lax
from jax.experimental import pallas as pl
from jax.experimental.pallas import tpu as pltpu


def _round_up(a, b):
    return ((a + b - 1) // b) * b


def _vmem_budget_bytes():
    """~85% of the per-core VMEM capacity; conservative 64 MiB fallback."""
    cap = 64 * 1024 * 1024
    try:
        info = pltpu.get_tpu_info()
        cap = int(getattr(info, "vmem_capacity_bytes", cap))
    except Exception:
        pass
    return int(cap * 0.85)


# ---------------------------------------------------------------------------
# Kernels
# ---------------------------------------------------------------------------

def _ffn_partial(x, w1, b1, w2, *, approx_gelu):
    """x @ W1^T + b1 -> GELU -> (dropout = identity, eval) -> @ W2^T, f32 out."""
    h = jnp.dot(x, w1, preferred_element_type=jnp.float32) + b1
    if approx_gelu:
        # tanh-form GELU in the compute dtype (bf16): tanh lands on the EUP
        # slot and the live (tm, th) intermediate is half the size.
        h = h.astype(w2.dtype)
        h = 0.5 * h * (1.0 + jnp.tanh(0.7978845608028654
                                      * (h + 0.044715 * h * h * h)))
    else:
        # Exact erf GELU (torch.nn.GELU default) in f32; single downcast.
        h = 0.5 * h * (1.0 + lax.erf(h * 0.7071067811865476))
        h = h.astype(w2.dtype)
    # Dropout (eval mode) == identity.
    return jnp.dot(h, w2, preferred_element_type=jnp.float32)


def _ffn_kernel_resident(x_ref, w1_ref, b1_ref, w2_ref, b2_ref, o_ref, *,
                         approx_gelu):
    """Weights fully resident in VMEM; single hidden pass per row tile."""
    acc = _ffn_partial(x_ref[...], w1_ref[...], b1_ref[...], w2_ref[...],
                       approx_gelu=approx_gelu)
    o_ref[...] = (acc + b2_ref[...]).astype(o_ref.dtype)


def _ffn_kernel_tiled_inplace(x_ref, w1_ref, b1_ref, w2_ref, b2_ref, o_ref, *,
                              approx_gelu):
    """Hidden-tiled; f32 output block doubles as the accumulator (no scratch)."""
    k = pl.program_id(1)

    @pl.when(k == 0)
    def _init():
        o_ref[...] = jnp.zeros_like(o_ref)

    o_ref[...] += _ffn_partial(x_ref[...], w1_ref[...], b1_ref[...],
                               w2_ref[...], approx_gelu=approx_gelu)

    @pl.when(k == pl.num_programs(1) - 1)
    def _finalize():
        o_ref[...] += b2_ref[...]


def _ffn_kernel_tiled_scratch(x_ref, w1_ref, b1_ref, w2_ref, b2_ref, o_ref,
                              acc_ref, *, approx_gelu):
    """Hidden-tiled; non-f32 output, accumulate in an f32 VMEM scratch."""
    k = pl.program_id(1)

    @pl.when(k == 0)
    def _init():
        acc_ref[...] = jnp.zeros_like(acc_ref)

    acc_ref[...] += _ffn_partial(x_ref[...], w1_ref[...], b1_ref[...],
                                 w2_ref[...], approx_gelu=approx_gelu)

    @pl.when(k == pl.num_programs(1) - 1)
    def _finalize():
        o_ref[...] = (acc_ref[...] + b2_ref[...]).astype(o_ref.dtype)


# ---------------------------------------------------------------------------
# Parameter prep (hoisted out of the per-call hot path)
# ---------------------------------------------------------------------------

def prepare_ffn_params(w1, b1, w2, b2, *, compute_dtype=jnp.bfloat16,
                       lane_multiple=128):
    """Transpose to (in, out), cast matmul operands to the MXU dtype, keep
    biases f32, zero-pad BOTH the model dim and the hidden dim to multiples of
    128 (lane-dense stores + clean 128-multiple hidden tiling)."""
    hidden, dim = w1.shape
    dp = _round_up(dim, lane_multiple)
    hp = _round_up(hidden, lane_multiple)
    w1t = jnp.zeros((dp, hp), compute_dtype)
    w1t = w1t.at[:dim, :hidden].set(jnp.transpose(w1).astype(compute_dtype))
    w2t = jnp.zeros((hp, dp), compute_dtype)
    w2t = w2t.at[:hidden, :dim].set(jnp.transpose(w2).astype(compute_dtype))
    b1r = jnp.zeros((1, hp), jnp.float32).at[:, :hidden].set(
        b1.astype(jnp.float32))
    b2r = jnp.zeros((1, dp), jnp.float32).at[:, :dim].set(
        b2.astype(jnp.float32))
    return w1t, b1r, w2t, b2r


# ---------------------------------------------------------------------------
# Wrapper
# ---------------------------------------------------------------------------

def feed_forward(x, params, *, tm=512, max_hidden_tile=None,
                 approx_gelu=False, vmem_limit_bytes=None):
    """x: (..., dim); params = prepare_ffn_params(w1, b1, w2, b2)."""
    w1t, b1r, w2t, b2r = params
    dp, hp = w1t.shape
    compute_dtype = w1t.dtype
    cbytes = jnp.dtype(compute_dtype).itemsize

    orig_shape = x.shape
    dim = orig_shape[-1]
    assert dp >= dim, "params were prepared for a smaller model dim"
    out_dtype = x.dtype
    obytes = jnp.dtype(out_dtype).itemsize

    x2 = x.reshape(-1, dim).astype(compute_dtype)
    N = x2.shape[0]

    budget = int(vmem_limit_bytes) if vmem_limit_bytes is not None \
        else _vmem_budget_bytes()

    # ---- row tile -------------------------------------------------------
    sub = 16 if cbytes < 4 else 8  # sublane packing multiple for compute dtype
    tm_eff = max(sub, (min(tm, _round_up(N, sub)) // sub) * sub)
    n_pad = _round_up(N, tm_eff)
    # v7x megacore: axis 0 is "parallel" (sharded across the 2 TensorCores);
    # keep >= 2 row tiles when N is small so a core isn't idle. Harmless on
    # 1-TC chips (v5e/v6e).
    if n_pad // tm_eff < 2 and N > sub:
        tm_half = _round_up((N + 1) // 2, sub)
        if tm_half < tm_eff:
            tm_eff = tm_half
            n_pad = _round_up(N, tm_eff)

    # ---- hidden tile / weight residency ----------------------------------
    def vmem_estimate(tm_, th_, with_scratch):
        v = (2 * tm_ * dp * cbytes          # x blocks (double-buffered)
             + 2 * dp * th_ * cbytes        # W1^T block(s)
             + 2 * th_ * dp * cbytes        # W2^T block(s)
             + 2 * (th_ + dp) * 4           # biases (f32)
             + 2 * tm_ * dp * obytes        # output blocks
             + tm_ * th_ * 4)               # live (tm, th) intermediate
        if with_scratch:
            v += tm_ * dp * 4               # f32 accumulator scratch
        return v

    use_scratch_if_tiled = (jnp.dtype(out_dtype) != jnp.dtype(jnp.float32))

    if max_hidden_tile is None and vmem_estimate(tm_eff, hp, False) <= budget:
        # Weights fully resident: each weight DMA'd exactly once for the call.
        th_eff = hp
    else:
        target = min(max_hidden_tile or 1024, hp)
        th_eff = 128
        cand = (target // 128) * 128
        while cand >= 128:
            if hp % cand == 0 and vmem_estimate(
                    tm_eff, cand, use_scratch_if_tiled) <= budget:
                th_eff = cand
                break
            cand -= 128
        # Last resort for very large model dims: shrink the row tile.
        while (vmem_estimate(tm_eff, th_eff, use_scratch_if_tiled) > budget
               and tm_eff > sub):
            tm_eff = max(sub, ((tm_eff // 2 + sub - 1) // sub) * sub)
        n_pad = _round_up(N, tm_eff)

    n_rows = n_pad // tm_eff

    # ---- pad activations --------------------------------------------------
    if (n_pad, dp) != (N, dim):
        x2 = jnp.pad(x2, ((0, n_pad - N), (0, dp - dim)))

    # ---- build the call ----------------------------------------------------
    if th_eff == hp:
        grid = (n_rows,)
        kernel = functools.partial(_ffn_kernel_resident,
                                   approx_gelu=approx_gelu)
        in_specs = [
            pl.BlockSpec((tm_eff, dp), lambda i: (i, 0)),   # x row tile
            pl.BlockSpec((dp, hp), lambda i: (0, 0)),       # W1^T (resident)
            pl.BlockSpec((1, hp), lambda i: (0, 0)),        # b1   (resident)
            pl.BlockSpec((hp, dp), lambda i: (0, 0)),       # W2^T (resident)
            pl.BlockSpec((1, dp), lambda i: (0, 0)),        # b2   (resident)
        ]
        out_specs = pl.BlockSpec((tm_eff, dp), lambda i: (i, 0))
        scratch = []
        dims = ("parallel",)
        k_steps = 1
    else:
        k_steps = hp // th_eff
        grid = (n_rows, k_steps)
        if use_scratch_if_tiled:
            kernel = functools.partial(_ffn_kernel_tiled_scratch,
                                       approx_gelu=approx_gelu)
            scratch = [pltpu.VMEM((tm_eff, dp), jnp.float32)]
        else:
            # f32 output: accumulate directly into the k-resident output block.
            kernel = functools.partial(_ffn_kernel_tiled_inplace,
                                       approx_gelu=approx_gelu)
            scratch = []
        in_specs = [
            pl.BlockSpec((tm_eff, dp), lambda i, k: (i, 0)),   # x (resident over k)
            pl.BlockSpec((dp, th_eff), lambda i, k: (0, k)),   # W1^T hidden block
            pl.BlockSpec((1, th_eff), lambda i, k: (0, k)),    # b1 block
            pl.BlockSpec((th_eff, dp), lambda i, k: (k, 0)),   # W2^T hidden block
            pl.BlockSpec((1, dp), lambda i, k: (0, 0)),        # b2 (resident)
        ]
        out_specs = pl.BlockSpec((tm_eff, dp), lambda i, k: (i, 0))
        dims = ("parallel", "arbitrary")

    # Advisory cost estimate (weights re-streamed once per row tile when the
    # hidden dim is tiled; DMA'd once when resident).
    flops = 4 * n_pad * dp * hp
    transcendentals = n_pad * hp
    weight_passes = 1 if th_eff == hp else n_rows
    bytes_accessed = int(
        n_pad * dp * cbytes
        + (w1t.size + w2t.size) * cbytes * weight_passes
        + (b1r.size + b2r.size) * 4 * weight_passes
        + n_pad * dp * obytes)

    out = pl.pallas_call(
        kernel,
        out_shape=jax.ShapeDtypeStruct((n_pad, dp), out_dtype),
        grid_spec=pltpu.PrefetchScalarGridSpec(
            num_scalar_prefetch=0,
            grid=grid,
            in_specs=in_specs,
            out_specs=out_specs,
            scratch_shapes=scratch,
        ),
        compiler_params=pltpu.CompilerParams(
            dimension_semantics=dims,
            vmem_limit_bytes=int(budget),
        ),
        cost_estimate=pl.CostEstimate(
            flops=flops,
            transcendentals=transcendentals,
            bytes_accessed=bytes_accessed),
    )(x2, w1t, b1r, w2t, b2r)

    return out[:N, :dim].reshape(orig_shape)


def feed_forward_ref(x, w1, b1, w2, b2):
    """Pure-JAX f32 reference matching torch semantics (eval mode)."""
    h = x @ w1.T + b1
    h = 0.5 * h * (1.0 + lax.erf(h / math.sqrt(2.0)))
    return h @ w2.T + b2


if __name__ == "__main__":
    # Small shapes consistent with the module: tokens of size d_model, FFN
    # hidden = d_ffn.
    batch, seq, dim, hidden = 2, 16, 64, 256

    key = jax.random.PRNGKey(0)
    kx, kw1, kb1, kw2, kb2 = jax.random.split(key, 5)

    x = jax.random.normal(kx, (batch, seq, dim), dtype=jnp.float32)

    # Deterministic parameter init (torch.nn.Linear-style uniform bounds).
    lim1 = 1.0 / math.sqrt(dim)
    lim2 = 1.0 / math.sqrt(hidden)
    w1 = jax.random.uniform(kw1, (hidden, dim), jnp.float32, -lim1, lim1)
    b1 = jax.random.uniform(kb1, (hidden,), jnp.float32, -lim1, lim1)
    w2 = jax.random.uniform(kw2, (dim, hidden), jnp.float32, -lim2, lim2)
    b2 = jax.random.uniform(kb2, (dim,), jnp.float32, -lim2, lim2)

    # One-time parameter prep (transpose / bf16 cast / 128-padding) — hoisted
    # out of the per-call hot path.
    params = prepare_ffn_params(w1, b1, w2, b2)
    ref = feed_forward_ref(x, w1, b1, w2, b2)

    # 1) Default path: weights resident in VMEM, single hidden pass, >=2 row
    #    tiles on the "parallel" axis (megacore-friendly).
    out_res = jax.block_until_ready(feed_forward(x, params))
    assert out_res.shape == x.shape
    assert jnp.allclose(out_res, ref, atol=3e-2, rtol=3e-2), \
        "resident-weight path mismatch vs reference"

    # 2) Hidden-tiled path with f32 output: accumulates in-place into the
    #    k-resident output block (no scratch), pl.when init/finalize.
    out_tiled = jax.block_until_ready(
        feed_forward(x, params, tm=16, max_hidden_tile=128))
    assert jnp.allclose(out_tiled, ref, atol=3e-2, rtol=3e-2), \
        "hidden-tiled (in-place) path mismatch vs reference"

    # 3) Hidden-tiled path with non-f32 output: separate f32 VMEM accumulator.
    out_bf16 = jax.block_until_ready(
        feed_forward(x.astype(jnp.bfloat16), params, tm=16, max_hidden_tile=128))
    assert jnp.allclose(out_bf16.astype(jnp.float32), ref,
                        atol=4e-2, rtol=4e-2), \
        "hidden-tiled (scratch-accumulator) path mismatch vs reference"

    print("KERNEL_OK")
</pallas_src>

<mosaic_0001>
module attributes {stable_mosaic.version = 11 : i64} {
  func.func @_ffn_kernel_resident(%arg0: i32, %arg1: memref<16x128xbf16, #tpu.memory_space<vmem>>, %arg2: memref<128x256xbf16, #tpu.memory_space<vmem>>, %arg3: memref<1x256xf32, #tpu.memory_space<vmem>>, %arg4: memref<256x128xbf16, #tpu.memory_space<vmem>>, %arg5: memref<1x128xf32, #tpu.memory_space<vmem>>, %arg6: memref<16x128xf32, #tpu.memory_space<vmem>>) attributes {dimension_semantics = [#tpu.dimension_semantics<parallel>], iteration_bounds = array<i64: 2>, scalar_prefetch = 0 : i64, scratch_operands = 0 : i64, tpu.core_type = #tpu.core_type<tc>, window_params = [{transform_indices = @transform_0, window_bounds = array<i64: 16, 128>}, {pipeline_mode = #tpu.pipeline_mode<synchronous>, transform_indices = @transform_1, window_bounds = array<i64: 128, 256>}, {pipeline_mode = #tpu.pipeline_mode<synchronous>, transform_indices = @transform_2, window_bounds = array<i64: 1, 256>}, {pipeline_mode = #tpu.pipeline_mode<synchronous>, transform_indices = @transform_3, window_bounds = array<i64: 256, 128>}, {pipeline_mode = #tpu.pipeline_mode<synchronous>, transform_indices = @transform_4, window_bounds = array<i64: 1, 128>}, {transform_indices = @transform_5, window_bounds = array<i64: 16, 128>}]} {
    %c0 = arith.constant 0 : index
    %c0_0 = arith.constant 0 : index
    %0 = vector.load %arg1[%c0, %c0_0] : memref<16x128xbf16, #tpu.memory_space<vmem>>, vector<16x128xbf16>
    %c0_1 = arith.constant 0 : index
    %c0_2 = arith.constant 0 : index
    %1 = vector.load %arg2[%c0_1, %c0_2] : memref<128x256xbf16, #tpu.memory_space<vmem>>, vector<128x256xbf16>
    %c0_3 = arith.constant 0 : index
    %c0_4 = arith.constant 0 : index
    %2 = vector.load %arg3[%c0_3, %c0_4] : memref<1x256xf32, #tpu.memory_space<vmem>>, vector<1x256xf32>
    %c0_5 = arith.constant 0 : index
    %c0_6 = arith.constant 0 : index
    %3 = vector.load %arg4[%c0_5, %c0_6] : memref<256x128xbf16, #tpu.memory_space<vmem>>, vector<256x128xbf16>
    %cst = arith.constant dense<0.000000e+00> : vector<16x256xf32>
    %4 = tpu.matmul %0, %1, %cst {dimension_numbers = #tpu.dot_dimension_numbers<[1], [0], [0], [1], [0, 0, 1, 1], [], []>} : vector<16x128xbf16>, vector<128x256xbf16>, vector<16x256xf32> -> vector<16x256xf32>
    %5 = vector.broadcast %2 : vector<1x256xf32> to vector<16x256xf32>
    %6 = arith.addf %4, %5 : vector<16x256xf32>
    %cst_7 = arith.constant 5.000000e-01 : f32
    %7 = vector.broadcast %cst_7 : f32 to vector<16x256xf32>
    %8 = arith.mulf %7, %6 : vector<16x256xf32>
    %cst_8 = arith.constant 0.707106769 : f32
    %9 = vector.broadcast %cst_8 : f32 to vector<16x256xf32>
    %10 = arith.mulf %6, %9 : vector<16x256xf32>
    %11 = math.erf %10 : vector<16x256xf32>
    %cst_9 = arith.constant 1.000000e+00 : f32
    %12 = vector.broadcast %cst_9 : f32 to vector<16x256xf32>
    %13 = arith.addf %12, %11 : vector<16x256xf32>
    %14 = arith.mulf %8, %13 : vector<16x256xf32>
    %15 = arith.truncf %14 : vector<16x256xf32> to vector<16x256xbf16>
    %cst_10 = arith.constant dense<0.000000e+00> : vector<16x128xf32>
    %16 = tpu.matmul %15, %3, %cst_10 {dimension_numbers = #tpu.dot_dimension_numbers<[1], [0], [0], [1], [0, 0, 1, 1], [], []>} : vector<16x256xbf16>, vector<256x128xbf16>, vector<16x128xf32> -> vector<16x128xf32>
    %c0_11 = arith.constant 0 : index
    %c0_12 = arith.constant 0 : index
    %17 = vector.load %arg5[%c0_11, %c0_12] : memref<1x128xf32, #tpu.memory_space<vmem>>, vector<1x128xf32>
    %18 = vector.broadcast %17 : vector<1x128xf32> to vector<16x128xf32>
    %19 = arith.addf %16, %18 : vector<16x128xf32>
    %c0_13 = arith.constant 0 : index
    %c0_14 = arith.constant 0 : index
    %20 = vector.load %arg6[%c0_13, %c0_14] : memref<16x128xf32, #tpu.memory_space<vmem>>, vector<16x128xf32>
    tpu.vector_store %arg6[%c0_13, %c0_14], %19 {strides = array<i32>} : memref<16x128xf32, #tpu.memory_space<vmem>>, vector<16x128xf32>,
    return
  }
  func.func @transform_0(%arg0: i32) -> (i32, i32) {
    %c0_i32 = arith.constant 0 : i32
    %c0_i32_0 = arith.constant 0 : i32
    return %arg0, %c0_i32 : i32, i32
  }
  func.func @transform_1(%arg0: i32) -> (i32, i32) {
    %c0_i32 = arith.constant 0 : i32
    %c0_i32_0 = arith.constant 0 : i32
    %c0_i32_1 = arith.constant 0 : i32
    return %c0_i32, %c0_i32_0 : i32, i32
  }
  func.func @transform_2(%arg0: i32) -> (i32, i32) {
    %c0_i32 = arith.constant 0 : i32
    %c0_i32_0 = arith.constant 0 : i32
    %c0_i32_1 = arith.constant 0 : i32
    return %c0_i32, %c0_i32_0 : i32, i32
  }
  func.func @transform_3(%arg0: i32) -> (i32, i32) {
    %c0_i32 = arith.constant 0 : i32
    %c0_i32_0 = arith.constant 0 : i32
    %c0_i32_1 = arith.constant 0 : i32
    return %c0_i32, %c0_i32_0 : i32, i32
  }
  func.func @transform_4(%arg0: i32) -> (i32, i32) {
    %c0_i32 = arith.constant 0 : i32
    %c0_i32_0 = arith.constant 0 : i32
    %c0_i32_1 = arith.constant 0 : i32
    return %c0_i32, %c0_i32_0 : i32, i32
  }
  func.func @transform_5(%arg0: i32) -> (i32, i32) {
    %c0_i32 = arith.constant 0 : i32
    %c0_i32_0 = arith.constant 0 : i32
    return %arg0, %c0_i32 : i32, i32
  }
}

</mosaic_0001>

<bundles_post_ra>
// kernel: tpu_custom_call.1
= control target key start
LH: loop header
LB: loop body
LE: loop exit
PB: predicated region body
PF: predicated region fallthrough
CT: control target
= control target key end

     0   :  { %10 = vsyncpa [#allocation3], 0  ;;  %s1671_s0 = inlined_call_operand.hbm [shape: bf16[32,128], index: 0, kind: input, shape index: {}]   ;;  %s1672_s1 = inlined_call_operand.hbm [shape: bf16[128,256], index: 1, kind: input, shape index: {}]   ;;  %s1673_s2 = inlined_call_operand.hbm [shape: f32[1,256], index: 2, kind: input, shape index: {}]   ;;  %s1674_s3 = inlined_call_operand.hbm [shape: bf16[256,128], index: 3, kind: input, shape index: {}]   ;;  %s1675_s4 = inlined_call_operand.vmem [shape: f32[1,128], index: 4, kind: input, shape index: {}]   ;;  %s1676_s5 = inlined_call_operand.hbm [shape: f32[32,128], index: 5, kind: output, shape index: {}]  }
   0x1   :  { %12 = vsyncpa [#allocation3 + $0x1], 0 }
   0x2   :  { %13 = vsyncpa [#allocation6], 0 }
   0x3   :  { %14 = vsyncpa [#allocation9], 0 }
   0x4   :  { %15 = vsyncpa [#allocation4], 0 }
   0x5   :  { %17 = vsyncpa [#allocation4 + $0x1], 0  ;;  %s1409_s18 = smov 0   ;;  %s1411_s19 = smov 0  }
   0x6   :  { %s1413_s20 = smov 0   ;;  %s1415_s21 = smov 0  }
   0x7 LB: > { %s1430_s22 = sadd.s32 4294967295, %s1368_s21   ;;  %s891_s23 = sadd.s32 4294967294, %s1368_s21   ;;  %s1368_s21 = sphi %s1415_s21, %s1689_s21   ;;  %s1364_s20 = sphi %s1413_s20, %s1688_s20   ;;  %s1360_s19 = sphi %s1411_s19, %s1687_s19   ;;  %s1356_s18 = sphi %s1409_s18, %s1686_s18  }
   0x8   : > { %p43_p0 = scmp.ne.s32.totalorder %s1360_s19, %s1356_s18  ;;  %p44_p1 = scmp.eq.s32.totalorder %s1430_s22, 0 }
   0x9   : > { %p151_p2 = scmp.eq.s32.totalorder %s1430_s22, 1  ;;  %p157_p3 = scmp.eq.s32.totalorder %s891_s23, 1 }
   0xa   : > { %p1439_p4 = por %p44_p1, %p43_p0  ;;  %p892_p5 = scmp.ge.s32.totalorder %s1368_s21, 1 }
   0xb   : > { %p1444_p6 = por %p157_p3, %p43_p0  ;;  %p164_p7 = scmp.lt.s32.totalorder %s1368_s21, 3 }
   0xc   : > { %s175_s28 = sshll.u32 %s1672_s1, 4  ;;  %s1370_s30 = smov [#allocation5]   ;;  %s176_s28 = int_to_ptr.hbm [resolvable:$true] %s175_s28 }
   0xd   : > { %p1452_p8 = pnand %p892_p5, %p164_p7  ;;  %s177_s6 = sshll.u32 %s1370_s30, 4  ;;  %s178_s6 = int_to_ptr.vmem [resolvable:$true] %s177_s6 }
   0xe   : > { %s190_s10 = sshll.u32 %s1673_s2, 4  ;;  %s1371_s11 = smov 128   ;;  %s191_s10 = int_to_ptr.hbm [resolvable:$true] %s190_s10 }
   0xf   : > { %p1098_p9 = pneg %p1452_p8  ;;  %s1372_s12 = smov 8  }
  0x10   : > { %s1373_s13 = smov [#allocation7]   ;;  %s201_s17 = sshll.u32 %s1674_s3, 4  ;;  %s202_s17 = int_to_ptr.hbm [resolvable:$true] %s201_s17 }
  0x11   : > { %p1460_p10 = pnand %p1098_p9, %p44_p1  ;;  %s192_s14 = sshll.u32 %s1373_s13, 4  ;;  %s193_s14 = int_to_ptr.vmem [resolvable:$true] %s192_s14 }
  0x12   : > { %s1374_s23 = smov [#allocation8]   ;;  %s1677_s27 = smov 64  }
  0x13   : > { %1101 = dma.hbm_to_vmem [thread:$0]  (!%p1460_p10), %s176_s28, 2048, %s178_s6, [#allocation6], %s1371_s11, %s1371_s11, %s1372_s12  }
  0x14   : > { %1104 = dma.hbm_to_vmem [thread:$0]  (!%p1460_p10), %s191_s10, 32, %s193_s14, [#allocation6]  }
  0x15   : > { %s203_s26 = sshll.u32 %s1374_s23, 4  ;;  %s1376_s28 = smov 4   ;;  %s204_s26 = int_to_ptr.vmem [resolvable:$true] %s203_s26 }
  0x16   : > { %1107 = dma.hbm_to_vmem [thread:$0]  (!%p1460_p10), %s202_s17, 2048, %s204_s26, [#allocation9], %s1677_s27, %s1677_s27, %s1376_s28  }
  0x17   : > { %s1481_s30 = sadd.s32 1, %s1368_s21   ;;  %s30_s8 = sadd.s32 1, %s1364_s20 }
  0x18   : > { %s27_s6 = ssub.s32 %s1368_s21, %s1481_s30  ;;  %p37_p13 = scmp.ne.s32.totalorder %s1364_s20, %s1360_s19 }
  0x19   : > { %p28_p12 = scmp.eq.s32.totalorder %s27_s6, 0  ;;  %p38_p0 = scmp.eq.s32.totalorder %s1368_s21, 0 }
  0x1a   : > { %p1494_p3 = por %p151_p2, %p37_p13  ;;  %p1119_p5 = scmp.lt.s32.totalorder %s1368_s21, 2 }
  0x1b   : > { %s1490_s9 = scalar_select %p28_p12, %s1364_s20, %s30_s8  }
  0x1c   : > { %s220_s7 = sand.u32 1, %s1364_s20   ;;  %s1047_s11 = sshll.u32 %s1368_s21, 3 }
  0x1d   : > { %p39_p7 = por %p38_p0, %p37_p13  ;;  %s897_s12 = sshll.u32 %s220_s7, 3 }
  0x1e   : > { %s229_s15 = scalar_lea.hbm %s1671_s0, %s1047_s11  ;;  %s224_s17 = scalar_lea.vmem [#allocation2], %s897_s12 }
  0x1f   : > { %s230_s16 = sshll.u32 %s229_s15, 4  ;;  %s232_s23 = sshll.u32 %s224_s17, 4  ;;  %s231_s16 = int_to_ptr.hbm [resolvable:$true] %s230_s16  ;;  %s233_s23 = int_to_ptr.vmem [resolvable:$true] %s232_s23 }
  0x20   : > { %p1504_p9 = pnand %p1119_p5, %p39_p7  ;;  %s221_s6 = scalar_lea.sflag [#allocation3], %s220_s7 }
  0x21   : > { %s1264_s8 = sshra.s32 %s231_s16, 4  ;;  %s1271_s12 = scalar_lea.hbm %s1671_s0, 16  ;;  %s1265_s8 = int_to_ptr.hbm [resolvable:$true] %s1264_s8 }
  0x22   : > { %s1266_s27 = scalar_lea.hbm %s1265_s8, 8  ;;  %p1268_p10 = pneg %p1504_p9 }
  0x23   : > { %p1267_p2 = scmp.ne.s32.totalorder %s1265_s8, %s1266_s27  ;;  %p1272_p0 = scmp.lt.s32.totalorder %s1265_s8, %s1671_s0 }
  0x24   : > { %p1273_p5 = scmp.lt.s32.totalorder %s1271_s12, %s1266_s27 }
  0x25   : > { %p1269_p12 = pnand %p1268_p10, %p1267_p2 }
  0x26   : > { %p1274_p7 = por %p1273_p5, %p1272_p0 }
  0x27   : > { %p1270_p13 = pneg %p1269_p12 }
  0x29   : > { %p1275_p11 = pnand %p1274_p7, %p1270_p13 }
  0x2b   : > { %1278 = shalt.err (!%p1275_p11)
}
  0x2c   : > { %s1684_s7 = smov 64   ;;  %244 = sbr.rel (%p1452_p8) target bundleno = 425 (0x1a9), region = 40 }
  0x2d   : > { %1111 = dma.hbm_to_vmem [thread:$0]  (!%p1504_p9), %s231_s16, 128, %s233_s23, %s221_s6, %s1684_s7, %s1684_s7, %s1376_s28  }
  0x2e   : > { %s1524_s17 = sand.u32 (!%p1452_p8), 1, %s1360_s19  }
  0x2f   : > { %s901_s8 = sshll.u32 (!%p1452_p8), %s1524_s17, 3  ;;  %s247_s27 = scalar_lea.sflag (!%p1452_p8), [#allocation3], %s1524_s17 }
  0x30   : > { %s1528_s11 = scalar_lea.vmem (!%p1452_p8), [#allocation2], %s901_s8 }
  0x31   : > { %1339 = dma.done.wait (%p1439_p4), %s247_s27, 128  }
  0x32   : > { %1341 = vsyncadd (%p1439_p4), %s247_s27, 4294967168 }
  0x33   : > { %1343 = dma.done.wait (%p44_p1), [#allocation6], 2080  }
  0x34   : > { %1345 = vsyncadd (%p44_p1), [#allocation6], 4294965216 }
  0x35   : > { %1347 = dma.done.wait (%p44_p1), [#allocation9], 2048  }
  0x36   : > { %1349 = vsyncadd (%p44_p1), [#allocation9], 4294965248  ;;  %v968_v0 = vld [vmem:[#allocation5 + $0x70] sm:$0xf]  ;;  %v1064_v1 = vld [vmem:[#allocation5 + $0x74] sm:$0xf0] }
  0x37   : > { %v1063_v2 = vld [vmem:[#allocation5 + $0x74] sm:$0xf]  ;;  %v969_v3 = vor.u32 %v1064_v1, %v968_v0  ;;  %v970_v4 = vld [vmem:[#allocation5 + $0x78] sm:$0xf0]  ;;  %v960_v5 = vld [vmem:[#allocation5 + $0x60] sm:$0xf] }
  0x38   : > { %v1062_v6 = vld [vmem:[#allocation5 + $0x64] sm:$0xf0]  ;;  %v973_v7 = vor.u32 %v1063_v2, %v970_v4  ;;  %v1061_v8 = vld [vmem:[#allocation5 + $0x64] sm:$0xf]  ;;  %v962_v9 = vld [vmem:[#allocation5 + $0x68] sm:$0xf0] }
  0x39   : > { %437 = vmatpush.bf16.msra.mxu0 %v969_v3  ;;  %v961_v10 = vor.u32 %v1062_v6, %v960_v5  ;;  %v965_v11 = vor.u32 %v1061_v8, %v962_v9  ;;  %v952_v12 = vld [vmem:[#allocation5 + $0x50] sm:$0xf]  ;;  %v1060_v13 = vld [vmem:[#allocation5 + $0x54] sm:$0xf0]  ;;  %v1059_v14 = vld [vmem:[#allocation5 + $0x54] sm:$0xf] }
  0x3a   : > { %451 = vmatpush.bf16.msra.mxu1 %v973_v7  ;;  %v954_v15 = vld [vmem:[#allocation5 + $0x58] sm:$0xf0]  ;;  %v953_v16 = vor.u32 %v1060_v13, %v952_v12  ;;  %v944_v18 = vld [vmem:[#allocation5 + $0x40] sm:$0xf]  ;;  %v1058_v19 = vld [vmem:[#allocation5 + $0x44] sm:$0xf0] }
  0x3b   : > { %v957_v17 = vor.u32 %v1059_v14, %v954_v15  ;;  %v1057_v20 = vld [vmem:[#allocation5 + $0x44] sm:$0xf]  ;;  %v946_v21 = vld [vmem:[#allocation5 + $0x48] sm:$0xf0]  ;;  %v945_v22 = vor.u32 %v1058_v19, %v944_v18  ;;  %v936_v24 = vld [vmem:[#allocation5 + $0x30] sm:$0xf] }
  0x3c   : > { %v949_v23 = vor.u32 %v1057_v20, %v946_v21  ;;  %v1056_v25 = vld [vmem:[#allocation5 + $0x34] sm:$0xf0]  ;;  %v1055_v26 = vld [vmem:[#allocation5 + $0x34] sm:$0xf]  ;;  %v938_v27 = vld [vmem:[#allocation5 + $0x38] sm:$0xf0] }
  0x3d   : > { %438 = vmatpush.bf16.msra.mxu0 %v961_v10  ;;  %v937_v28 = vor.u32 %v1056_v25, %v936_v24  ;;  %v941_v29 = vor.u32 %v1055_v26, %v938_v27  ;;  %v928_v30 = vld [vmem:[#allocation5 + $0x20] sm:$0xf]  ;;  %v1054_v31 = vld [vmem:[#allocation5 + $0x24] sm:$0xf0]  ;;  %v1053_v32 = vld [vmem:[#allocation5 + $0x24] sm:$0xf] }
  0x3e   : > { %452 = vmatpush.bf16.msra.mxu1 %v965_v11  ;;  %v930_v33 = vld [vmem:[#allocation5 + $0x28] sm:$0xf0]  ;;  %v929_v34 = vor.u32 %v1054_v31, %v928_v30  ;;  %v920_v36 = vld [vmem:[#allocation5 + $0x10] sm:$0xf]  ;;  %v1052_v37 = vld [vmem:[#allocation5 + $0x14] sm:$0xf0] }
  0x3f   : > { %v933_v35 = vor.u32 %v1053_v32, %v930_v33  ;;  %v1051_v38 = vld [vmem:[#allocation5 + $0x14] sm:$0xf]  ;;  %v922_v39 = vld [vmem:[#allocation5 + $0x18] sm:$0xf0]  ;;  %v921_v40 = vor.u32 %v1052_v37, %v920_v36  ;;  %v912_v42 = vld [vmem:[#allocation5] sm:$0xf] }
  0x40   : > { %v925_v41 = vor.u32 %v1051_v38, %v922_v39  ;;  %v1050_v43 = vld [vmem:[#allocation5 + $0x4] sm:$0xf0]  ;;  %v1049_v44 = vld [vmem:[#allocation5 + $0x4] sm:$0xf]  ;;  %v914_v45 = vld [vmem:[#allocation5 + $0x8] sm:$0xf0] }
  0x41   : > { %439 = vmatpush.bf16.msra.mxu0 %v953_v16  ;;  %v913_v46 = vor.u32 %v1050_v43, %v912_v42  ;;  %v917_v47 = vor.u32 %v1049_v44, %v914_v45  ;;  %v1048_v48 = vld [vmem:[%s1528_s11] sm:$0xff]  ;;  %v313_v49 = vld [vmem:[#allocation7] sm:$0x3]  ;;  %v1069_v8 = vld [vmem:[#allocation8 + $0x20] sm:$0xff]  ;;  %s905_s28 = sshll.u32 %s1524_s17, 4  ;;  %s1081_s16 = sshll.u32 %s1430_s22, 4 }
  0x42   : > { %453 = vmatpush.bf16.msra.mxu1 %v957_v17  ;;  %v347_v50 = vperm.slane %v313_v49, 0  ;;  %v348_v51 = vperm.slane %v313_v49, 1  ;;  %v1072_v53 = vld [vmem:[#allocation8 + $0x38] sm:$0xff]  ;;  %v1071_v60 = vld [vmem:[#allocation8 + $0x30] sm:$0xff]  ;;  %v1070_v0 = vld [vmem:[#allocation8 + $0x28] sm:$0xff]  ;;  %s292_s23 = scalar_lea.vmem [#allocation10], %s905_s28  ;;  %s785_s13 = scalar_lea.hbm %s1676_s5, %s1081_s16 }
  0x43   : > { %v1080_v54 = vld [vmem:[#allocation8 + $0x78] sm:$0xff]  ;;  %743 = vmatpush.bf16.msra.mxu2 %v1072_v53  ;;  %v1079_v61 = vld [vmem:[#allocation8 + $0x70] sm:$0xff]  ;;  %v1078_v1 = vld [vmem:[#allocation8 + $0x68] sm:$0xff]  ;;  %s786_s12 = sshll.u32 %s292_s23, 4  ;;  %s788_s14 = sshll.u32 %s785_s13, 4  ;;  %s787_s12 = int_to_ptr.vmem [resolvable:$true] %s786_s12  ;;  %s789_s14 = int_to_ptr.hbm [resolvable:$true] %s788_s14 }
  0x44   : > { %757 = vmatpush.bf16.msra.mxu3 %v1080_v54  ;;  %v1077_v9 = vld [vmem:[#allocation8 + $0x60] sm:$0xff]  ;;  %v1068_v24 = vld [vmem:[#allocation8 + $0x18] sm:$0xff]  ;;  %v1067_v32 = vld [vmem:[#allocation8 + $0x10] sm:$0xff]  ;;  %s774_s15 = scalar_lea.sflag [#allocation4], %s1524_s17  ;;  %s1308_s7 = sshra.s32 %s789_s14, 4  ;;  %s1309_s7 = int_to_ptr.hbm [resolvable:$true] %s1308_s7 }
  0x45   : > { %440 = vmatpush.bf16.msra.mxu0 %v945_v22  ;;  %v1076_v25 = vld [vmem:[#allocation8 + $0x58] sm:$0xff]  ;;  %v1075_v33 = vld [vmem:[#allocation8 + $0x50] sm:$0xff]  ;;  %v1074_v53 = vld [vmem:[#allocation8 + $0x48] sm:$0xff]  ;;  %s1310_s22 = scalar_lea.hbm %s1309_s7, 16  ;;  %s1314_s11 = scalar_lea.hbm %s1676_s5, 32 }
  0x46   : > { %454 = vmatpush.bf16.msra.mxu1 %v949_v23  ;;  %p1311_p1 = scmp.ne.s32.totalorder %s1309_s7, %s1310_s22  ;;  %p1315_p11 = scmp.lt.s32.totalorder %s1309_s7, %s1676_s5 }
  0x47   : > { %744 = vmatpush.bf16.msra.mxu2 %v1071_v60  ;;  %p1316_p9 = scmp.lt.s32.totalorder %s1314_s11, %s1310_s22 }
  0x48   : > { %758 = vmatpush.bf16.msra.mxu3 %v1079_v61  ;;  %p1312_p4 = pnand %p1311_p1, %p1494_p3 }
  0x49   : > { %441 = vmatpush.bf16.msra.mxu0 %v937_v28  ;;  %p1317_p2 = por %p1316_p9, %p1315_p11 }
  0x4a   : > { %455 = vmatpush.bf16.msra.mxu1 %v941_v29  ;;  %p1313_p8 = pneg %p1312_p4 }
  0x4b   : > { %745 = vmatpush.bf16.msra.mxu2 %v1070_v0 }
  0x4c   : > { %759 = vmatpush.bf16.msra.mxu3 %v1078_v1  ;;  %p1318_p10 = pnand %p1317_p2, %p1313_p8 }
  0x4d   : > { %442 = vmatpush.bf16.msra.mxu0 %v929_v34 }
  0x4e   : > { %456 = vmatpush.bf16.msra.mxu1 %v933_v35 }
  0x4f   : > { %746 = vmatpush.bf16.msra.mxu2 %v1069_v8 }
  0x50   : > { %760 = vmatpush.bf16.msra.mxu3 %v1077_v9  ;;  %v1065_v9 = vld [vmem:[#allocation8] sm:$0xff] }
  0x51   : > { %443 = vmatpush.bf16.msra.mxu0 %v921_v40 }
  0x52   : > { %457 = vmatpush.bf16.msra.mxu1 %v925_v41 }
  0x53   : > { %747 = vmatpush.bf16.msra.mxu2 %v1068_v24 }
  0x54   : > { %761 = vmatpush.bf16.msra.mxu3 %v1076_v25 }
  0x55   : > { %444 = vmatpush.bf16.msra.mxu0 %v913_v46 }
  0x56   : > { %458 = vmatpush.bf16.msra.mxu1 %v917_v47 }
  0x57   : > { %748 = vmatpush.bf16.msra.mxu2 %v1067_v32 }
  0x58   : > { %445 = vmatmul.bf16.vlgmr.msra.gmra.mxu0 %v1048_v48  ;;  %762 = vmatpush.bf16.msra.mxu3 %v1075_v33 }
  0x59   : > { %459 = vmatmul.bf16.vlgmr.msra.gmra.mxu1 %v1048_v48 }
  0x5c   : > { %763 = vmatpush.bf16.msra.mxu3 %v1074_v53 }
  0xd5   : > { %v446_v52 = vpop.f32.mrf.mxu0 }
  0xd6   : > { %v1543_v55 = vadd.f32 %v446_v52, %v347_v50  ;;  %v460_v56 = vpop.f32.mrf.mxu1  ;;  %v1066_v52 = vld [vmem:[#allocation8 + $0x8] sm:$0xff] }
  0xd7   : > { %v1545_v57 = vadd.f32 %v460_v56, %v348_v51  ;;  %749 = vmatpush.bf16.msra.mxu2 %v1066_v52 }
  0xd8   : > { %v1548_v58 = vmul.f32 0.70710677, %v1543_v55 }
  0xd9   : > { %v1551_v59 = vmul.f32 0.70710677, %v1545_v57 }
  0xda   : > { %v473_v62 = vmul.f32 %v1548_v58, %v1548_v58 }
  0xdb   : > { %v513_v63 = vmul.f32 %v1551_v59, %v1551_v59  ;;  %750 = vmatpush.bf16.msra.mxu2 %v1065_v9 }
  0xdc   : > { %v1557_v2 = vmin.f32 %v473_v62, 16.0 }
  0xdd   : > { %v1559_v3 = vmin.f32 %v513_v63, 16.0  ;;  %v448_v4 = vpop.f32.mrf.mxu0 }
  0xde   : > { %v475_v5 = vmul.f32 2.1237322e-06, %v1557_v2  ;;  %v1562_v6 = vadd.f32 %v448_v4, %v347_v50  ;;  %v462_v7 = vpop.f32.mrf.mxu1  ;;  %v486_v12 = vmul.f32 3.8918573e-05, %v1557_v2 }
  0xdf   : > { %v515_v10 = vmul.f32 2.1237322e-06, %v1559_v3  ;;  %v1565_v11 = vadd.f32 %v462_v7, %v348_v51  ;;  %v526_v13 = vmul.f32 3.8918573e-05, %v1559_v3 }
  0xe0   : > { %v476_v14 = vadd.f32 0.00028619796, %v475_v5  ;;  %v1570_v15 = vmul.f32 0.70710677, %v1562_v6  ;;  %v487_v20 = vadd.f32 0.001143296, %v486_v12 }
  0xe1   : > { %v516_v16 = vadd.f32 0.00028619796, %v515_v10  ;;  %v1573_v17 = vmul.f32 0.70710677, %v1565_v11  ;;  %v527_v21 = vadd.f32 0.001143296, %v526_v13 }
  0xe2   : > { %v477_v18 = vmul.f32 %v476_v14, %v1557_v2  ;;  %v553_v19 = vmul.f32 %v1570_v15, %v1570_v15  ;;  %v488_v28 = vmul.f32 %v487_v20, %v1557_v2  ;;  %v1073_v10 = vld [vmem:[#allocation8 + $0x40] sm:$0xff] }
  0xe3   : > { %v517_v22 = vmul.f32 %v516_v16, %v1559_v3  ;;  %v593_v23 = vmul.f32 %v1573_v17, %v1573_v17  ;;  %v528_v29 = vmul.f32 %v527_v21, %v1559_v3  ;;  %764 = vmatpush.bf16.msra.mxu3 %v1073_v10 }
  0xe4   : > { %v478_v26 = vadd.f32 0.0036580483, %v477_v18  ;;  %v1581_v27 = vmin.f32 %v553_v19, 16.0  ;;  %v489_v35 = vadd.f32 0.014752088, %v488_v28 }
  0xe5   : > { %v518_v30 = vadd.f32 0.0036580483, %v517_v22  ;;  %v1585_v31 = vmin.f32 %v593_v23, 16.0  ;;  %v529_v38 = vadd.f32 0.014752088, %v528_v29 }
  0xe6   : > { %v555_v34 = vmul.f32 2.1237322e-06, %v1581_v27  ;;  %v566_v36 = vmul.f32 3.8918573e-05, %v1581_v27  ;;  %v479_v40 = vmul.f32 %v478_v26, %v1557_v2  ;;  %v490_v42 = vmul.f32 %v489_v35, %v1557_v2 }
  0xe7   : > { %v595_v37 = vmul.f32 2.1237322e-06, %v1585_v31  ;;  %v606_v39 = vmul.f32 3.8918573e-05, %v1585_v31  ;;  %v530_v45 = vmul.f32 %v529_v38, %v1559_v3  ;;  %v519_v50 = vmul.f32 %v518_v30, %v1559_v3 }
  0xe8   : > { %v556_v41 = vadd.f32 0.00028619796, %v555_v34  ;;  %v567_v43 = vadd.f32 0.001143296, %v566_v36  ;;  %v491_v48 = vadd.f32 0.112945676, %v490_v42 }
  0xe9   : > { %v596_v44 = vadd.f32 0.00028619796, %v595_v37  ;;  %v607_v46 = vadd.f32 0.001143296, %v606_v39  ;;  %v531_v54 = vadd.f32 0.112945676, %v530_v45 }
  0xea   : > { %v557_v47 = vmul.f32 %v556_v41, %v1581_v27  ;;  %v568_v49 = vmul.f32 %v567_v43, %v1581_v27  ;;  %v480_v60 = vadd.f32 0.05243302, %v479_v40  ;;  %v492_v62 = vmul.f32 %v491_v48, %v1557_v2 }
  0xeb   : > { %v597_v51 = vmul.f32 %v596_v44, %v1585_v31  ;;  %v608_v56 = vmul.f32 %v607_v46, %v1585_v31  ;;  %v532_v0 = vmul.f32 %v531_v54, %v1559_v3  ;;  %v520_v16 = vadd.f32 0.05243302, %v519_v50 }
  0xec   : > { %v558_v61 = vadd.f32 0.0036580483, %v557_v47  ;;  %v569_v63 = vadd.f32 0.014752088, %v568_v49  ;;  %v493_v7 = vadd.f32 0.4994258, %v492_v62  ;;  %v481_v14 = vmul.f32 %v480_v60, %v1557_v2 }
  0xed   : > { %v609_v1 = vadd.f32 0.014752088, %v608_v56  ;;  %v598_v5 = vadd.f32 0.0036580483, %v597_v51  ;;  %v533_v12 = vadd.f32 0.4994258, %v532_v0  ;;  %v521_v29 = vmul.f32 %v520_v16, %v1559_v3 }
  0xee   : > { %v559_v4 = vmul.f32 %v558_v61, %v1581_v27  ;;  %v570_v8 = vmul.f32 %v569_v63, %v1581_v27  ;;  %v494_v18 = vmul.f32 %v493_v7, %v1557_v2  ;;  %v482_v28 = vadd.f32 0.18741608, %v481_v14 }
  0xef   : > { %v610_v13 = vmul.f32 %v609_v1, %v1585_v31  ;;  %v534_v20 = vmul.f32 %v533_v12, %v1559_v3  ;;  %v599_v23 = vmul.f32 %v598_v5, %v1585_v31  ;;  %v522_v37 = vadd.f32 0.18741608, %v521_v29 }
  0xf0   : > { %v571_v19 = vadd.f32 0.112945676, %v570_v8  ;;  %v560_v22 = vadd.f32 0.05243302, %v559_v4  ;;  %v495_v24 = vadd.f32 1.0, %v494_v18  ;;  %v483_v36 = vmul.f32 %v482_v28, %v1557_v2 }
  0xf1   : > { %v611_v21 = vadd.f32 0.112945676, %v610_v13  ;;  %v535_v26 = vadd.f32 1.0, %v534_v20  ;;  %v600_v34 = vadd.f32 0.05243302, %v599_v23  ;;  %v523_v47 = vmul.f32 %v522_v37, %v1559_v3 }
  0xf2   : > { %v572_v25 = vmul.f32 %v571_v19, %v1581_v27  ;;  %1166 = vrcp.f32 %v495_v24  ;;  %v561_v33 = vmul.f32 %v560_v22, %v1581_v27  ;;  %v484_v46 = vadd.f32 1.1283791, %v483_v36 }
  0xf3   : > { %v612_v30 = vmul.f32 %v611_v21, %v1585_v31  ;;  %1168 = vrcp.f32 %v535_v26  ;;  %v601_v42 = vmul.f32 %v600_v34, %v1585_v31  ;;  %v505_v50 = vand.u32 2147483647, %v495_v24 }
  0xf4   : > { %v573_v32 = vadd.f32 0.4994258, %v572_v25  ;;  %v562_v41 = vadd.f32 0.18741608, %v561_v33  ;;  %v507_v53 = vand.u32 2147483648, %v495_v24  ;;  %v547_v60 = vand.u32 2147483648, %v535_v26 }
  0xf5   : > { %v613_v38 = vadd.f32 0.4994258, %v612_v30  ;;  %v602_v52 = vadd.f32 0.18741608, %v601_v42  ;;  %v485_v61 = vmul.f32 %v484_v46, %v1548_v58  ;;  %v524_v62 = vadd.f32 1.1283791, %v523_v47 }
  0xf6   : > { %v574_v35 = vmul.f32 %v573_v32, %v1581_v27  ;;  %v563_v2 = vmul.f32 %v562_v41, %v1581_v27  ;;  %vm501_vm2 = vweird.f32 %v495_v24  ;;  %vm506_vm3 = vcmp.eq.f32.partialorder %v505_v50, 8.507059e+37 }
  0xf7   : > { %v614_v43 = vmul.f32 %v613_v38, %v1585_v31  ;;  %v545_v1 = vand.u32 2147483647, %v535_v26  ;;  %v508_v27 = vor.u32 1.1754944e-38, %v507_v53  ;;  %vm541_vm5 = vweird.f32 %v535_v26 }
  0xf8   : > { %v575_v39 = vadd.f32 1.0, %v574_v35  ;;  %v1167_v40 = vpop.eup %1166  ;;  %v564_v7 = vadd.f32 1.1283791, %v563_v2  ;;  %v603_v8 = vmul.f32 %v602_v52, %v1585_v31  ;;  %v548_v10 = vor.u32 1.1754944e-38, %v547_v60 }
  0xf9   : > { %v1169_v44 = vpop.eup %1168  ;;  %v497_v45 = vmul.f32 %v1167_v40, %v495_v24  ;;  %v1617_v51 = vadd.f32 1.0, %v614_v43  ;;  %vm502_vm0 = vweird.f32 %v1167_v40  ;;  %vm546_vm8 = vcmp.eq.f32.partialorder %v545_v1, 8.507059e+37 }
  0xfa   : > { %1170 = vrcp.f32 %v575_v39  ;;  %v537_v48 = vmul.f32 %v1169_v44, %v535_v26  ;;  %vm542_vm1 = vweird.f32 %v1169_v44  ;;  %vm503_vm4 = vmor %vm501_vm2, %vm502_vm0  ;;  %v585_v13 = vand.u32 2147483647, %v575_v39 }
  0xfb   : > { %v498_v49 = vsub.f32 1.0, %v497_v45  ;;  %1172 = vrcp.f32 %v1617_v51  ;;  %vm543_vm6 = vmor %vm541_vm5, %vm542_vm1  ;;  %v587_v18 = vand.u32 2147483648, %v575_v39  ;;  %v525_v23 = vmul.f32 %v524_v62, %v1551_v59 }
  0xfc   : > { %v538_v54 = vsub.f32 1.0, %v537_v48  ;;  %v565_v31 = vmul.f32 %v564_v7, %v1570_v15  ;;  %v604_v24 = vadd.f32 1.1283791, %v603_v8  ;;  %vm581_vm9 = vweird.f32 %v575_v39 }
  0xfd   : > { %v499_v56 = vmul.f32 %v1167_v40, %v498_v49  ;;  %vm586_vm10 = vcmp.eq.f32.partialorder %v585_v13, 8.507059e+37  ;;  %v588_v28 = vor.u32 1.1754944e-38, %v587_v18  ;;  %v625_v30 = vand.u32 2147483647, %v1617_v51 }
  0xfe   : > { %v539_v63 = vmul.f32 %v1169_v44, %v538_v54  ;;  %v627_v32 = vand.u32 2147483648, %v1617_v51  ;;  %vm621_vm13 = vweird.f32 %v1617_v51  ;;  %v605_v15 = vmul.f32 %v604_v24, %v1573_v17 }
  0xff   : > { %v500_v0 = vadd.f32 %v1167_v40, %v499_v56  ;;  %vm626_vm15 = vcmp.eq.f32.partialorder %v625_v30, 8.507059e+37  ;;  %v467_v45 = vmul.f32 0.5, %v1562_v6  ;;  %v468_v2 = vmul.f32 0.5, %v1565_v11  ;;  %v1165_v6 = vld [vmem:[%s1675_s4] ss:$0 sm:$0xff] }
 0x100   : > { %v1171_v3 = vpop.eup %1170  ;;  %v540_v5 = vadd.f32 %v1169_v44, %v539_v63  ;;  %v628_v38 = vor.u32 1.1754944e-38, %v627_v32 }
 0x101   : > { %v577_v4 = vmul.f32 %v1171_v3, %v575_v39  ;;  %v504_v9 = vsel %vm503_vm4, %v1167_v40, %v500_v0  ;;  %v1173_v16 = vpop.eup %1172  ;;  %vm582_vm7 = vweird.f32 %v1171_v3 }
 0x102   : > { %v509_v58 = vsel %vm506_vm3, %v508_v27, %v504_v9  ;;  %v544_v14 = vsel %vm543_vm6, %v1169_v44, %v540_v5  ;;  %v617_v22 = vmul.f32 %v1173_v16, %v1617_v51  ;;  %vm583_vm11 = vmor %vm581_vm9, %vm582_vm7  ;;  %vm622_vm12 = vweird.f32 %v1173_v16 }
 0x103   : > { %v578_v12 = vsub.f32 1.0, %v577_v4  ;;  %v510_v19 = vmul.f32 %v509_v58, %v485_v61  ;;  %v549_v21 = vsel %vm546_vm8, %v548_v10, %v544_v14  ;;  %vm623_vm14 = vmor %vm621_vm13, %vm622_vm12  ;;  %v465_v44 = vmul.f32 0.5, %v1543_v55 }
 0x104   : > { %v618_v26 = vsub.f32 1.0, %v617_v22  ;;  %v550_v29 = vmul.f32 %v549_v21, %v525_v23  ;;  %v466_v51 = vmul.f32 0.5, %v1545_v57 }
 0x105   : > { %v579_v20 = vmul.f32 %v1171_v3, %v578_v12  ;;  %v974_v33 = vclamps-f32 %v510_v19, 1.0 }
 0x106   : > { %v619_v35 = vmul.f32 %v1173_v16, %v618_v26  ;;  %v975_v41 = vclamps-f32 %v550_v29, 1.0 }
 0x107   : > { %v580_v25 = vadd.f32 %v1171_v3, %v579_v20  ;;  %v633_v40 = vadd.f32 1.0, %v974_v33 }
 0x108   : > { %v620_v37 = vadd.f32 %v1173_v16, %v619_v35  ;;  %v634_v17 = vadd.f32 1.0, %v975_v41 }
 0x109   : > { %v584_v34 = vsel %vm583_vm11, %v1171_v3, %v580_v25  ;;  %v637_v48 = vmul.f32 %v633_v40, %v465_v44 }
 0x10a   : > { %v589_v36 = vsel %vm586_vm10, %v588_v28, %v584_v34  ;;  %v624_v42 = vsel %vm623_vm14, %v1173_v16, %v620_v37  ;;  %v638_v54 = vmul.f32 %v634_v17, %v466_v51 }
 0x10b   : > { %v590_v59 = vmul.f32 %v589_v36, %v565_v31  ;;  %v629_v43 = vsel %vm626_vm15, %v628_v38, %v624_v42 }
 0x10c   : > { %v630_v47 = vmul.f32 %v629_v43, %v605_v15 }
 0x10d   : > { %v976_v39 = vclamps-f32 %v590_v59, 1.0 }
 0x10e   : > { %v977_v50 = vclamps-f32 %v630_v47, 1.0 }
 0x10f   : > { %v635_v46 = vadd.f32 1.0, %v976_v39 }
 0x110   : > { %v636_v53 = vadd.f32 1.0, %v977_v50 }
 0x111   : > { %v639_v49 = vmul.f32 %v635_v46, %v467_v45 }
 0x112   : > { %v640_v56 = vmul.f32 %v636_v53, %v468_v2 }
 0x113   : > { %v641_v52 = vpack.c.bf16 %v639_v49, %v637_v48 }
 0x114   : > { %v642_v55 = vpack.c.bf16 %v640_v56, %v638_v54 }
 0x115   : > { %751 = vmatmul.bf16.vlgmr.msra.gmra.mxu2 %v641_v52 }
 0x116   : > { %765 = vmatmul.bf16.vlgmr.msra.gmra.mxu3 %v642_v55 }
 0x198   : > { %v752_v60 = vpop.f32.mrf.mxu2 }
 0x199   : > { %v753_v61 = vadd.f32 %v1165_v6, %v752_v60  ;;  %v766_v62 = vpop.f32.mrf.mxu3 }
 0x19b   : > { %v767_v57 = vadd.f32 %v766_v62, %v753_v61 }
 0x19d   : > { %771 = vst [vmem:[%s292_s23] sm:$0xff] %v767_v57 }
 0x1a0   : > { %v754_v11 = vpop.f32.mrf.mxu2 }
 0x1a1   : > { %v755_v63 = vadd.f32 %v1165_v6, %v754_v11  ;;  %v768_v3 = vpop.f32.mrf.mxu3 }
 0x1a3   : > { %v769_v0 = vadd.f32 %v768_v3, %v755_v63 }
 0x1a5   : > { %772 = vst [vmem:[%s292_s23 + $0x8] sm:$0xff] %v769_v0 }
 0x1a6   : > { %1321 = shalt.err (!%p1318_p10)
}
 0x1a7   : > { %s1377_s17 = smov 128   ;;  %s1378_s28 = smov 8  }
 0x1a8   : > { %1096 = dma.vmem_to_hbm [thread:$0]  (%p1494_p3), %s787_s12, 256, %s789_s14, %s774_s15, %s1377_s17, %s1377_s17, %s1378_s28  }
 0x1a9 PF: > { %s803_s16 = sand.u32 1, %s1356_s18   ;;  %p1685_p12 = scmp.ge.s32.totalorder %s1368_s21, 2 }
 0x1aa   : > { %s804_s23 = scalar_lea.sflag [#allocation4], %s803_s16 }
 0x1ab   : > { %p1113_p13 = pnand %p1685_p12, %p1444_p6 }
 0x1ad   : > { %p1114_p0 = pneg %p1113_p13 }
 0x1af   : > { %1351 = dma.done.wait (%p1114_p0), %s804_s23, 256  }
 0x1b0   : > { %1353 = vsyncadd (%p1114_p0), %s804_s23, 4294967040  ;;  %p20_p5 = scmp.ge.s32.totalorder %s1481_s30, 4   ;;  %s1686_s18 = smov %s1360_s19 }
 0x1b1   : > { %s1687_s19 = smov %s1364_s20  ;;  %s1688_s20 = smov %s1490_s9 }
 0x1b2   : > { %s1689_s21 = smov %s1481_s30  ;;  %22 = sbr.rel (!%p20_p5) target bundleno = 7 (0x7), region = 97 }
 0x1b7   :  { %810 = vsyncpa [#allocation3], 1 }
 0x1b8   :  { %812 = vsyncpa [#allocation3 + $0x1], 1 }
 0x1b9   :  { %813 = vsyncpa [#allocation6], 1 }
 0x1ba   :  { %814 = vsyncpa [#allocation9], 1 }
 0x1bb   :  { %815 = vsyncpa [#allocation4], 1 }
 0x1bc   :  { %817 = vsyncpa [#allocation4 + $0x1], 1 }

</bundles_post_ra>
